<compile_context>
chip_gen: v6e
topology: v6e:2x2x1
jax: 0.10.0
libtpu: 0.0.40
codegen_flags: <defaults>
</compile_context>

<pallas_src>
import jax
import jax.numpy as jnp
import numpy as np
from jax.experimental import pallas as pl
from jax.experimental.pallas import tpu as pltpu

_MiB = 1024 * 1024


def _vmem_capacity_bytes():
    """Per-core VMEM capacity; conservative (v7x-sized) fallback."""
    try:
        return int(pltpu.get_tpu_info().vmem_capacity_bytes)
    except Exception:
        return 64 * _MiB


def _pick_chunk(chans, hw, itemsize, stream_budget_bytes, max_chunk=8192):
    """Largest 128-multiple chunk whose double-buffered (1, C, chunk) tile fits."""
    if hw <= 128:
        return hw                                    # single full-extent block
    per_lane = 2 * chans * itemsize                  # 2 pipeline buffers, 1 batch row
    budget_chunk = (stream_budget_bytes // max(per_lane, 1)) // 128 * 128
    hw_floor = (hw // 128) * 128
    return int(max(128, min(budget_chunk, max_chunk, hw_floor)))


def _make_kernel(hw, chunk, lanes, n_sub, num_chunks):
    need_mask = (hw % chunk) != 0
    inv_hw = 1.0 / float(hw)
    last = num_chunks - 1
    tail_valid = hw - last * chunk                   # valid elems in last chunk (static)

    def _fold_full(x_ref, s_acc, m_acc, n_blocks):
        # Steady state: sub-block load+cast, plain add/max, no masking.
        for j in range(n_blocks):
            lo = j * lanes
            blk = x_ref[:, :, lo:lo + lanes]         # (1, C, lanes), x dtype
            s_acc = s_acc + blk.astype(jnp.float32)
            m_acc = jnp.maximum(m_acc, blk)
        return s_acc, m_acc

    def kernel(x_ref, w1t_ref, w2t_ref, o_ref, sum_acc, max_acc):
        k = pl.program_id(1)

        @pl.when(k == 0)
        def _init():
            sum_acc[...] = jnp.zeros_like(sum_acc)
            max_acc[...] = jnp.full_like(max_acc, -jnp.inf)

        if not need_mask:
            s, m = _fold_full(x_ref, sum_acc[...], max_acc[...], n_sub)
            sum_acc[...] = s
            max_acc[...] = m
        else:
            @pl.when(k < last)
            def _steady():
                s, m = _fold_full(x_ref, sum_acc[...], max_acc[...], n_sub)
                sum_acc[...] = s
                max_acc[...] = m

            @pl.when(k == last)
            def _tail():
                s = sum_acc[...]
                m = max_acc[...]
                lane = jax.lax.broadcasted_iota(jnp.int32, (1, 1, lanes), 2)
                for j in range(n_sub):
                    lo = j * lanes
                    n_valid = tail_valid - lo        # static Python int
                    if n_valid <= 0:
                        break                        # fully OOB: never loaded
                    blk = x_ref[:, :, lo:lo + lanes]
                    if n_valid >= lanes:             # fully in-bounds sub-block
                        s = s + blk.astype(jnp.float32)
                        m = jnp.maximum(m, blk)
                    else:                            # partial: select-based mask
                        valid = lane < n_valid
                        s = s + jnp.where(valid, blk.astype(jnp.float32), 0.0)
                        m = jnp.maximum(
                            m, jnp.where(valid, blk, jnp.full_like(blk, -jnp.inf)))
                sum_acc[...] = s
                max_acc[...] = m

        @pl.when(k == last)
        def _finalize():
            # One cross-lane (XLU) reduce each, then the tiny FC epilogue —
            # all on register values, no pooled-row scratch.
            avg = jnp.sum(sum_acc[...], axis=-1) * inv_hw             # (1, C) f32
            mx = jnp.max(max_acc[...], axis=-1).astype(jnp.float32)   # (1, C) f32
            w1t = w1t_ref[...]                                        # (C, Cr)
            w2t = w2t_ref[...]                                        # (Cr, C)
            h_a = jnp.dot(avg, w1t, preferred_element_type=jnp.float32)
            h_m = jnp.dot(mx, w1t, preferred_element_type=jnp.float32)
            h_a = h_a * jax.nn.sigmoid(h_a)                           # SiLU
            h_m = h_m * jax.nn.sigmoid(h_m)
            y = (jnp.dot(h_a, w2t, preferred_element_type=jnp.float32)
                 + jnp.dot(h_m, w2t, preferred_element_type=jnp.float32))
            out = jax.nn.sigmoid(y)                                   # (1, C)
            o_ref[...] = out.reshape(o_ref.shape).astype(o_ref.dtype)

    return kernel


def channel_attention(x, w1, w2, chunk=None):
    """ChannelAttention forward.

    x:  (B, C, H, W)  activations (float32 or bfloat16)
    w1: (C//r, C)     fc1 1x1-conv weight (bias=False)
    w2: (C, C//r)     fc2 1x1-conv weight (bias=False)
    Returns sigmoid(fc2(silu(fc1(avg))) + fc2(silu(fc1(max)))) as (B, C, 1, 1).
    """
    B, C, H, W = x.shape
    Cr = w1.shape[0]
    hw = H * W
    x_flat = x.reshape(B, C, hw)
    itemsize = x_flat.dtype.itemsize

    vmem_cap = _vmem_capacity_bytes()
    # Generation-aware streamed-tile budget: ~44 MiB on 128 MiB parts
    # (v5e/v6e), ~22 MiB on 64 MiB-per-core parts (v7x).
    stream_budget = min(int(vmem_cap * 0.35), 44 * _MiB)

    if chunk is None:
        chunk = _pick_chunk(C, hw, itemsize, stream_budget)
    else:
        chunk = int(min(chunk, hw))
    if not (chunk == hw or chunk % 128 == 0):
        raise ValueError("chunk must be a multiple of 128 or the full H*W")

    lanes = 128 if chunk >= 128 else chunk
    n_sub = chunk // lanes
    num_chunks = -(-hw // chunk)

    # Pre-transposed weights so both matmuls are plain (M, K) @ (K, N).
    w1t = jnp.transpose(w1).astype(jnp.float32)      # (C, Cr)
    w2t = jnp.transpose(w2).astype(jnp.float32)      # (Cr, C)

    kernel = _make_kernel(hw, chunk, lanes, n_sub, num_chunks)

    # Per-core VMEM: double-buffered x tile + accumulators + weights + out.
    vmem_need = (2 * C * chunk * itemsize
                 + C * lanes * 4 + C * lanes * itemsize
                 + 2 * 2 * C * Cr * 4
                 + 2 * C * itemsize)
    vmem_limit = int(min(max(2 * vmem_need, 16 * _MiB), int(vmem_cap * 0.75)))

    cost = pl.CostEstimate(
        flops=int(2 * B * C * hw + 8 * B * C * Cr),
        transcendentals=int(B * (2 * Cr + C)),
        bytes_accessed=int(B * C * hw * itemsize + 2 * C * Cr * 4
                           + B * C * itemsize),
    )

    out = pl.pallas_call(
        kernel,
        out_shape=jax.ShapeDtypeStruct((B, 1, C), x.dtype),
        grid_spec=pltpu.PrefetchScalarGridSpec(
            num_scalar_prefetch=0,
            grid=(B, num_chunks),
            in_specs=[
                pl.BlockSpec((1, C, chunk), lambda b, k: (b, 0, k)),
                # TODO(synk): single-buffering (pipeline_mode=pl.Buffered(1)) on
                # these constant-index weights saves ~C*Cr*4 B of VMEM at large C.
                pl.BlockSpec((C, Cr), lambda b, k: (0, 0)),   # resident weights
                pl.BlockSpec((Cr, C), lambda b, k: (0, 0)),   # resident weights
            ],
            out_specs=pl.BlockSpec((1, 1, C), lambda b, k: (b, 0, 0)),
            scratch_shapes=[
                pltpu.VMEM((1, C, lanes), jnp.float32),       # running sum (f32)
                pltpu.VMEM((1, C, lanes), x_flat.dtype),      # running max (exact in x dtype)
            ],
        ),
        compiler_params=pltpu.CompilerParams(
            dimension_semantics=("parallel", "arbitrary"),
            vmem_limit_bytes=vmem_limit,
        ),
        cost_estimate=cost,
    )(x_flat, w1t, w2t)

    return out.reshape(B, C, 1, 1)


def _reference(x, w1, w2):
    # Pure-JAX reference matching the PyTorch module semantics.
    B, C, H, W = x.shape
    avg = jnp.mean(x, axis=(2, 3))      # (B, C)
    mx = jnp.max(x, axis=(2, 3))        # (B, C)

    def branch(p):
        h = p @ w1.T                    # (B, Cr)
        h = h * jax.nn.sigmoid(h)       # SiLU
        return h @ w2.T                 # (B, C)

    out = jax.nn.sigmoid(branch(avg) + branch(mx))
    return out.reshape(B, C, 1, 1)


if __name__ == "__main__":
    key = jax.random.PRNGKey(0)
    # (shape, ratio, forced_chunk, dtype): exercises (a) single chunk per batch
    # row, (b) multi-chunk even split, (c) multi-chunk with masked partial tail
    # (HW=144, chunk=128), (d) bf16 stream with bf16 max accumulator.
    cases = [
        ((2, 32, 16, 16), 8, None, jnp.float32),
        ((2, 32, 16, 16), 8, 128, jnp.float32),
        ((2, 48, 12, 12), 8, 128, jnp.float32),
        ((2, 32, 16, 16), 8, 128, jnp.bfloat16),
    ]
    for (B, C, H, W), ratio, chunk, dtype in cases:
        Cr = max(1, C // ratio)
        key, kx, k1, k2 = jax.random.split(key, 4)
        x = jax.random.normal(kx, (B, C, H, W), dtype=jnp.float32).astype(dtype)
        # Weight shapes from nn.Conv2d(C, C//r, 1) / nn.Conv2d(C//r, C, 1).
        w1 = jax.random.normal(k1, (Cr, C), dtype=jnp.float32) * 0.1
        w2 = jax.random.normal(k2, (C, Cr), dtype=jnp.float32) * 0.1

        out = jax.block_until_ready(channel_attention(x, w1, w2, chunk=chunk))
        ref = jax.block_until_ready(_reference(x.astype(jnp.float32), w1, w2))
        tol = 1e-5 if dtype == jnp.float32 else 2e-2
        np.testing.assert_allclose(np.asarray(out.astype(jnp.float32)),
                                   np.asarray(ref), rtol=tol, atol=tol)
    print("KERNEL_OK")
</pallas_src>

<mosaic_0001>
module attributes {stable_mosaic.version = 11 : i64} {
  func.func @kernel(%arg0: i32, %arg1: i32, %arg2: memref<1x32x256xf32, #tpu.memory_space<vmem>>, %arg3: memref<32x4xf32, #tpu.memory_space<vmem>>, %arg4: memref<4x32xf32, #tpu.memory_space<vmem>>, %arg5: memref<1x1x32xf32, #tpu.memory_space<vmem>>, %arg6: memref<1x32x128xf32, #tpu.memory_space<vmem>>, %arg7: memref<1x32x128xf32, #tpu.memory_space<vmem>>) attributes {dimension_semantics = [#tpu.dimension_semantics<parallel>, #tpu.dimension_semantics<arbitrary>], iteration_bounds = array<i64: 2, 1>, scalar_prefetch = 0 : i64, scratch_operands = 2 : i64, tpu.core_type = #tpu.core_type<tc>, window_params = [{transform_indices = @transform_0, window_bounds = array<i64: 1, 32, 256>}, {pipeline_mode = #tpu.pipeline_mode<synchronous>, transform_indices = @transform_1, window_bounds = array<i64: 32, 4>}, {pipeline_mode = #tpu.pipeline_mode<synchronous>, transform_indices = @transform_2, window_bounds = array<i64: 4, 32>}, {transform_indices = @transform_3, window_bounds = array<i64: 1, 1, 32>}]} {
    %c0_i32 = arith.constant 0 : i32
    %0 = arith.cmpi eq, %arg1, %c0_i32 : i32
    %1 = arith.extui %0 : i1 to i32
    %c0_i32_0 = arith.constant 0 : i32
    %2 = arith.cmpi ne, %1, %c0_i32_0 : i32
    scf.if %2 {
      %cst = arith.constant 0.000000e+00 : f32
      %16 = vector.broadcast %cst : f32 to vector<1x32x128xf32>
      %c0_19 = arith.constant 0 : index
      %c0_20 = arith.constant 0 : index
      %c0_21 = arith.constant 0 : index
      %17 = vector.load %arg6[%c0_19, %c0_20, %c0_21] : memref<1x32x128xf32, #tpu.memory_space<vmem>>, vector<1x32x128xf32>
      tpu.vector_store %arg6[%c0_19, %c0_20, %c0_21], %16 {strides = array<i32>} : memref<1x32x128xf32, #tpu.memory_space<vmem>>, vector<1x32x128xf32>,
      %cst_22 = arith.constant 0xFF800000 : f32
      %18 = vector.broadcast %cst_22 : f32 to vector<1x32x128xf32>
      %c0_23 = arith.constant 0 : index
      %c0_24 = arith.constant 0 : index
      %c0_25 = arith.constant 0 : index
      %19 = vector.load %arg7[%c0_23, %c0_24, %c0_25] : memref<1x32x128xf32, #tpu.memory_space<vmem>>, vector<1x32x128xf32>
      tpu.vector_store %arg7[%c0_23, %c0_24, %c0_25], %18 {strides = array<i32>} : memref<1x32x128xf32, #tpu.memory_space<vmem>>, vector<1x32x128xf32>,
    } else {
    }
    %c0 = arith.constant 0 : index
    %c0_1 = arith.constant 0 : index
    %c0_2 = arith.constant 0 : index
    %3 = vector.load %arg6[%c0, %c0_1, %c0_2] : memref<1x32x128xf32, #tpu.memory_space<vmem>>, vector<1x32x128xf32>
    %c0_3 = arith.constant 0 : index
    %c0_4 = arith.constant 0 : index
    %c0_5 = arith.constant 0 : index
    %4 = vector.load %arg7[%c0_3, %c0_4, %c0_5] : memref<1x32x128xf32, #tpu.memory_space<vmem>>, vector<1x32x128xf32>
    %c0_6 = arith.constant 0 : index
    %c0_7 = arith.constant 0 : index
    %c0_8 = arith.constant 0 : index
    %5 = vector.load %arg2[%c0_6, %c0_7, %c0_8] : memref<1x32x256xf32, #tpu.memory_space<vmem>>, vector<1x32x128xf32>
    %6 = arith.addf %3, %5 : vector<1x32x128xf32>
    %7 = arith.maximumf %4, %5 : vector<1x32x128xf32>
    %c0_9 = arith.constant 0 : index
    %c0_10 = arith.constant 0 : index
    %c128 = arith.constant 128 : index
    %8 = vector.load %arg2[%c0_9, %c0_10, %c128] : memref<1x32x256xf32, #tpu.memory_space<vmem>>, vector<1x32x128xf32>
    %9 = arith.addf %6, %8 : vector<1x32x128xf32>
    %10 = arith.maximumf %7, %8 : vector<1x32x128xf32>
    %c0_11 = arith.constant 0 : index
    %c0_12 = arith.constant 0 : index
    %c0_13 = arith.constant 0 : index
    %11 = vector.load %arg6[%c0_11, %c0_12, %c0_13] : memref<1x32x128xf32, #tpu.memory_space<vmem>>, vector<1x32x128xf32>
    tpu.vector_store %arg6[%c0_11, %c0_12, %c0_13], %9 {strides = array<i32>} : memref<1x32x128xf32, #tpu.memory_space<vmem>>, vector<1x32x128xf32>,
    %c0_14 = arith.constant 0 : index
    %c0_15 = arith.constant 0 : index
    %c0_16 = arith.constant 0 : index
    %12 = vector.load %arg7[%c0_14, %c0_15, %c0_16] : memref<1x32x128xf32, #tpu.memory_space<vmem>>, vector<1x32x128xf32>
    tpu.vector_store %arg7[%c0_14, %c0_15, %c0_16], %10 {strides = array<i32>} : memref<1x32x128xf32, #tpu.memory_space<vmem>>, vector<1x32x128xf32>,
    %c0_i32_17 = arith.constant 0 : i32
    %13 = arith.cmpi eq, %arg1, %c0_i32_17 : i32
    %14 = arith.extui %13 : i1 to i32
    %c0_i32_18 = arith.constant 0 : i32
    %15 = arith.cmpi ne, %14, %c0_i32_18 : i32
    scf.if %15 {
      %c0_19 = arith.constant 0 : index
      %c0_20 = arith.constant 0 : index
      %c0_21 = arith.constant 0 : index
      %16 = vector.load %arg6[%c0_19, %c0_20, %c0_21] : memref<1x32x128xf32, #tpu.memory_space<vmem>>, vector<1x32x128xf32>
      %cst = arith.constant dense<0.000000e+00> : vector<1x32xf32>
      %17 = vector.multi_reduction <add>, %16, %cst [2] : vector<1x32x128xf32> to vector<1x32xf32>
      %cst_22 = arith.constant 3.906250e-03 : f32
      %18 = vector.broadcast %cst_22 : f32 to vector<1x32xf32>
      %19 = arith.mulf %17, %18 : vector<1x32xf32>
      %c0_23 = arith.constant 0 : index
      %c0_24 = arith.constant 0 : index
      %c0_25 = arith.constant 0 : index
      %20 = vector.load %arg7[%c0_23, %c0_24, %c0_25] : memref<1x32x128xf32, #tpu.memory_space<vmem>>, vector<1x32x128xf32>
      %cst_26 = arith.constant dense<0xFF800000> : vector<1x32xf32>
      %21 = vector.multi_reduction <maximumf>, %20, %cst_26 [2] : vector<1x32x128xf32> to vector<1x32xf32>
      %c0_27 = arith.constant 0 : index
      %c0_28 = arith.constant 0 : index
      %22 = vector.load %arg3[%c0_27, %c0_28] : memref<32x4xf32, #tpu.memory_space<vmem>>, vector<32x4xf32>
      %c0_29 = arith.constant 0 : index
      %c0_30 = arith.constant 0 : index
      %23 = vector.load %arg4[%c0_29, %c0_30] : memref<4x32xf32, #tpu.memory_space<vmem>>, vector<4x32xf32>
      %cst_31 = arith.constant dense<0.000000e+00> : vector<1x4xf32>
      %24 = tpu.matmul %19, %22, %cst_31 {dimension_numbers = #tpu.dot_dimension_numbers<[1], [0], [0], [1], [0, 0, 1, 1], [], []>} : vector<1x32xf32>, vector<32x4xf32>, vector<1x4xf32> -> vector<1x4xf32>
      %cst_32 = arith.constant dense<0.000000e+00> : vector<1x4xf32>
      %25 = tpu.matmul %21, %22, %cst_32 {dimension_numbers = #tpu.dot_dimension_numbers<[1], [0], [0], [1], [0, 0, 1, 1], [], []>} : vector<1x32xf32>, vector<32x4xf32>, vector<1x4xf32> -> vector<1x4xf32>
      %26 = arith.negf %24 : vector<1x4xf32>
      %27 = math.exp %26 : vector<1x4xf32>
      %cst_33 = arith.constant 1.000000e+00 : f32
      %28 = vector.broadcast %cst_33 : f32 to vector<1x4xf32>
      %29 = arith.addf %28, %27 : vector<1x4xf32>
      %30 = arith.divf %28, %29 : vector<1x4xf32>
      %31 = arith.mulf %24, %30 : vector<1x4xf32>
      %32 = arith.negf %25 : vector<1x4xf32>
      %33 = math.exp %32 : vector<1x4xf32>
      %cst_34 = arith.constant 1.000000e+00 : f32
      %34 = vector.broadcast %cst_34 : f32 to vector<1x4xf32>
      %35 = arith.addf %34, %33 : vector<1x4xf32>
      %36 = arith.divf %34, %35 : vector<1x4xf32>
      %37 = arith.mulf %25, %36 : vector<1x4xf32>
      %cst_35 = arith.constant dense<0.000000e+00> : vector<1x32xf32>
      %38 = tpu.matmul %31, %23, %cst_35 {dimension_numbers = #tpu.dot_dimension_numbers<[1], [0], [0], [1], [0, 0, 1, 1], [], []>} : vector<1x4xf32>, vector<4x32xf32>, vector<1x32xf32> -> vector<1x32xf32>
      %cst_36 = arith.constant dense<0.000000e+00> : vector<1x32xf32>
      %39 = tpu.matmul %37, %23, %cst_36 {dimension_numbers = #tpu.dot_dimension_numbers<[1], [0], [0], [1], [0, 0, 1, 1], [], []>} : vector<1x4xf32>, vector<4x32xf32>, vector<1x32xf32> -> vector<1x32xf32>
      %40 = arith.addf %38, %39 : vector<1x32xf32>
      %41 = arith.negf %40 : vector<1x32xf32>
      %42 = math.exp %41 : vector<1x32xf32>
      %cst_37 = arith.constant 1.000000e+00 : f32
      %43 = vector.broadcast %cst_37 : f32 to vector<1x32xf32>
      %44 = arith.addf %43, %42 : vector<1x32xf32>
      %45 = arith.divf %43, %44 : vector<1x32xf32>
      %46 = vector.shape_cast %45 : vector<1x32xf32> to vector<1x1x32xf32>
      %c0_38 = arith.constant 0 : index
      %c0_39 = arith.constant 0 : index
      %c0_40 = arith.constant 0 : index
      %47 = vector.load %arg5[%c0_38, %c0_39, %c0_40] : memref<1x1x32xf32, #tpu.memory_space<vmem>>, vector<1x1x32xf32>
      tpu.vector_store %arg5[%c0_38, %c0_39, %c0_40], %46 {strides = array<i32>} : memref<1x1x32xf32, #tpu.memory_space<vmem>>, vector<1x1x32xf32>,
    } else {
    }
    return
  }
  func.func @transform_0(%arg0: i32, %arg1: i32) -> (i32, i32, i32) {
    %c0_i32 = arith.constant 0 : i32
    %c0_i32_0 = arith.constant 0 : i32
    return %arg0, %c0_i32, %arg1 : i32, i32, i32
  }
  func.func @transform_1(%arg0: i32, %arg1: i32) -> (i32, i32) {
    %c0_i32 = arith.constant 0 : i32
    %c0_i32_0 = arith.constant 0 : i32
    %c0_i32_1 = arith.constant 0 : i32
    return %c0_i32, %c0_i32_0 : i32, i32
  }
  func.func @transform_2(%arg0: i32, %arg1: i32) -> (i32, i32) {
    %c0_i32 = arith.constant 0 : i32
    %c0_i32_0 = arith.constant 0 : i32
    %c0_i32_1 = arith.constant 0 : i32
    return %c0_i32, %c0_i32_0 : i32, i32
  }
  func.func @transform_3(%arg0: i32, %arg1: i32) -> (i32, i32, i32) {
    %c0_i32 = arith.constant 0 : i32
    %c0_i32_0 = arith.constant 0 : i32
    %c0_i32_1 = arith.constant 0 : i32
    return %arg0, %c0_i32, %c0_i32_0 : i32, i32, i32
  }
}

</mosaic_0001>

<bundles_post_ra>
// kernel: tpu_custom_call.1
= control target key start
LH: loop header
LB: loop body
LE: loop exit
PB: predicated region body
PF: predicated region fallthrough
CT: control target
= control target key end

     0   :  { %8 = vsyncpa [#allocation5], 0  ;;  %s1213_s0 = inlined_call_operand.hbm [shape: f32[2,32,256], index: 0, kind: input, shape index: {}]   ;;  %s1214_s1 = inlined_call_operand.vmem [shape: f32[32,4], index: 1, kind: input, shape index: {}]   ;;  %s1215_s2 = inlined_call_operand.vmem [shape: f32[4,32], index: 2, kind: input, shape index: {}]   ;;  %s1216_s3 = inlined_call_operand.hbm [shape: f32[2,1,32], index: 3, kind: output, shape index: {}]  }
   0x1   :  { %10 = vsyncpa [#allocation5 + $0x1], 0 }
   0x2   :  { %11 = vsyncpa [#allocation6], 0 }
   0x3   :  { %13 = vsyncpa [#allocation6 + $0x1], 0  ;;  %s1037_s12 = smov 0   ;;  %s1039_s13 = smov 0  }
   0x4   :  { %s1041_s14 = smov 0   ;;  %s1043_s15 = smov 0  }
   0x5   :  { %s1045_s16 = smov 0   ;;  %s1047_s17 = smov 0  }
   0x6 LB: > { %s755_s18 = sadd.s32 4294967295, %s1009_s17   ;;  %s756_s19 = sadd.s32 4294967294, %s1009_s17   ;;  %s1009_s17 = sphi %s1047_s17, %s19_s17   ;;  %s1005_s16 = sphi %s1045_s16, %s1227_s16   ;;  %s1001_s15 = sphi %s1043_s15, %s1226_s15   ;;  %s997_s14 = sphi %s1041_s14, %s1225_s14   ;;  %s993_s13 = sphi %s1039_s13, %s1224_s13   ;;  %s989_s12 = sphi %s1037_s12, %s1223_s12  }
   0x7   : > { %s31_s20 = sadd.s32 1, %s1005_s16  ;;  %s40_s21 = sadd.s32 1, %s997_s14 }
   0x8   : > { %p33_p0 = scmp.ge.s32.totalorder %s31_s20, 2  ;;  %p47_p1 = scmp.ne.s32.totalorder %s997_s14, %s993_s13 }
   0x9   : > { %p48_p2 = scmp.eq.s32.totalorder %s1009_s17, 0  ;;  %p53_p3 = scmp.ne.s32.totalorder %s993_s13, %s989_s12 }
   0xa   : > { %s1229_s20 = smov (%p33_p0, %s31_s20), 0  ;;  %p54_p5 = scmp.eq.s32.totalorder %s755_s18, 0 }
   0xb   : > { %p1078_p4 = por %p48_p2, %p47_p1  ;;  %s35_s23 = ssub.s32 %s1005_s16, %s1229_s20 }
   0xc   : > { %p119_p6 = scmp.eq.s32.totalorder %s755_s18, 1  ;;  %p38_p7 = scmp.eq.s32.totalorder %s35_s23, 0 }
   0xd   : > { %p1084_p8 = por %p54_p5, %p53_p3  ;;  %p125_p10 = scmp.eq.s32.totalorder %s756_s19, 1 }
   0xe   : > { %p1088_p9 = por %p119_p6, %p47_p1  ;;  %p835_p13 = scmp.lt.s32.totalorder %s1009_s17, 2 }
   0xf   : > { %s1093_s26 = scalar_select %p38_p7, %s997_s14, %s40_s21  }
  0x10   : > { %p1095_p11 = por %p125_p10, %p53_p3  ;;  %s151_s28 = sand.u32 1, %s997_s14  }
  0x11   : > { %s759_s29 = sshll.u32 %s151_s28, 6  ;;  %s776_s30 = sshll.u32 %s1005_s16, 10 }
  0x12   : > { %s163_s6 = scalar_lea.hbm %s1213_s0, %s776_s30  ;;  %s155_s7 = scalar_lea.vmem [#allocation4], %s759_s29 }
  0x13   : > { %s164_s8 = sshll.u32 %s155_s7, 4  ;;  %p1108_p0 = pnand %p835_p13, %p1078_p4  ;;  %s165_s8 = int_to_ptr.vmem [resolvable:$true] %s164_s8 }
  0x14   : > { %p762_p1 = scmp.ge.s32.totalorder %s1009_s17, 1  ;;  %s152_s10 = scalar_lea.sflag [#allocation5], %s151_s28 }
  0x15   : > { %p903_p2 = pneg %p1108_p0  ;;  %s914_s11 = scalar_lea.vmem %s165_s8, 1024 }
  0x16   : > { %p915_p3 = scmp.ne.s32.totalorder %s165_s8, %s914_s11  ;;  %s1011_s18 = smov [#allocation4]  }
  0x17   : > { %s919_s19 = sshll.u32 %s1011_s18, 4  ;;  %s920_s19 = int_to_ptr.vmem [resolvable:$false] %s919_s19 }
  0x18   : > { %p917_p5 = pnand %p915_p3, %p903_p2  ;;  %s921_s21 = scalar_lea.vmem %s920_s19, 2048 }
  0x19   : > { %p922_p7 = scmp.lt.s32.totalorder %s165_s8, %s920_s19  ;;  %p923_p10 = scmp.lt.s32.totalorder %s921_s21, %s914_s11 }
  0x1a   : > { %p918_p6 = pneg %p917_p5 }
  0x1b   : > { %p924_p12 = por %p923_p10, %p922_p7 }
  0x1d   : > { %p925_p4 = pnand %p924_p12, %p918_p6 }
  0x1f   : > { %928 = shalt.err (!%p925_p4)
}
  0x20   : > { %s1012_s22 = smov 256   ;;  %s1013_s23 = smov 16  }
  0x21   : > { %830 = dma.hbm_to_vmem [thread:$0]  (!%p1108_p0), %s163_s6, 1024, %s165_s8, %s152_s10, %s1012_s22, %s1012_s22, %s1013_s23  }
  0x22   : > { %p172_p13 = scmp.lt.s32.totalorder %s1009_s17, 3 }
  0x24   : > { %p173_p2 = pnand %p762_p1, %p172_p13 }
  0x25   : > { %s1121_s28 = sand.u32 (!%p173_p2), 1, %s993_s13  }
  0x26   : > { %176 = sbr.rel (%p173_p2) target bundleno = 669 (0x29d), region = 32  ;;  %s763_s29 = sshll.u32 (!%p173_p2), %s1121_s28, 6 }
  0x27   : > { %s179_s30 = scalar_lea.sflag (!%p173_p2), [#allocation5], %s1121_s28  ;;  %s182_s4 = scalar_lea.vmem (!%p173_p2), [#allocation4], %s763_s29 }
  0x2b   : > { %980 = dma.done.wait (%p1084_p8), %s179_s30, 1024  }
  0x2c   : > { %982 = vsyncadd (%p1084_p8), %s179_s30, 4294966272  ;;  %v227_v0 = vld [vmem:[%s182_s4 + $0x20] sm:$0xff]  ;;  %v239_v1 = vld [vmem:[%s182_s4 + $0x28] sm:$0xff]  ;;  %v1014_v16 = vmov 0.0   ;;  %vm1015_vm0 = vmmov 0   ;;  %v297_v21 = vlaneseq  ;;  %vm308_vm1 = vcmask 130112  }
  0x2d   : > { %v225_v2 = vld [vmem:[%s182_s4] sm:$0xff]  ;;  %v243_v3 = vadd.f32 %v239_v1, %v227_v0  ;;  %v237_v4 = vld [vmem:[%s182_s4 + $0x8] sm:$0xff]  ;;  %v228_v5 = vld [vmem:[%s182_s4 + $0x30] sm:$0xff]  ;;  %v247_v15 = vmax.f32 %v227_v0, %v239_v1  ;;  %791 = vmatprep.subr.mxu0 %v1014_v16  ;;  %802 = vmatprep.subr.mxu1 %v1014_v16  ;;  %vm315_vm2 = vcmask 195712   ;;  %vm322_vm3 = vcmask 261312   ;;  %s773_s21 = sshll.u32 %s1001_s15, 4 }
  0x2e   : > { %v240_v6 = vld [vmem:[%s182_s4 + $0x38] sm:$0xff]  ;;  %v241_v7 = vadd.f32 %v237_v4, %v225_v2  ;;  %v226_v8 = vld [vmem:[%s182_s4 + $0x10] sm:$0xff]  ;;  %v245_v13 = vmax.f32 %v225_v2, %v237_v4  ;;  %v289_v19 = vld [vmem:[%s1214_s1 + $0x8] sm:$0xff]  ;;  %799 = vmatprep.mubr.msk.f32.mxu0 %vm1015_vm0, %v1014_v16  ;;  %810 = vmatprep.mubr.msk.f32.mxu1 %vm1015_vm0, %v1014_v16  ;;  %v298_v22 = vand.u32 127, %v297_v21  ;;  %v300_v23 = vshrl.u32 %v297_v21, 7  ;;  %s203_s22 = scalar_lea.vmem [#allocation7], %s1121_s28 }
  0x2f   : > { %v238_v9 = vld [vmem:[%s182_s4 + $0x18] sm:$0xff]  ;;  %268 = vadd.xlane.f32.xlu1 %v243_v3  ;;  %v244_v10 = vadd.f32 %v240_v6, %v228_v5  ;;  %v248_v14 = vmax.f32 %v228_v5, %v240_v6  ;;  %v290_v18 = vld [vmem:[%s1214_s1 + $0x10] sm:$0xff]  ;;  %v288_v20 = vld [vmem:[%s1214_s1] sm:$0xff]  ;;  %vm324_vm4 = vcmask 261120   ;;  %vm510_vm5 = vcmask 1043456   ;;  %s678_s23 = sshll.u32 %s203_s22, 4  ;;  %s1171_s4 = scalar_lea.hbm %s1216_s3, %s773_s21  ;;  %s679_s23 = int_to_ptr.vmem [resolvable:$true] %s678_s23 }
  0x30   : > { %264 = vadd.xlane.f32.xlu0 %v241_v7  ;;  %v242_v11 = vadd.f32 %v238_v9, %v226_v8  ;;  %v246_v12 = vmax.f32 %v226_v8, %v238_v9  ;;  %v291_v17 = vld [vmem:[%s1214_s1 + $0x18] sm:$0xff]  ;;  %v317_v25 = vadd.s32 4294967272, %v298_v22  ;;  %v303_v26 = vadd.s32 4294967288, %v298_v22  ;;  %v292_v57 = vld [vmem:[%s1215_s2] sm:$0xf]  ;;  %s666_s24 = scalar_lea.sflag [#allocation6], %s1121_s28 }
  0x31   : > { %792 = vmatpush3.msra.mxu0 %v291_v17  ;;  %803 = vmatpush3.msra.mxu1 %v291_v17  ;;  %v310_v27 = vadd.s32 4294967280, %v298_v22  ;;  %v301_v29 = vsub.s32 %v298_v22, %v300_v23  ;;  %vm506_vm6 = vcmask 31744   ;;  %vm663_vm7 = vcmask 253952   ;;  %s929_s5 = scalar_lea.vmem %s679_s23, 16  ;;  %s1016_s6 = smov [#allocation7]  }
  0x32   : > { %793 = vmatprep.subr.mxu0 %v1014_v16  ;;  %804 = vmatprep.subr.mxu1 %v1014_v16  ;;  %v320_v31 = vsub.s32 %v317_v25, %v300_v23  ;;  %v306_v33 = vsub.s32 %v303_v26, %v300_v23  ;;  %p930_p8 = scmp.ne.s32.totalorder %s679_s23, %s929_s5  ;;  %s933_s7 = sshll.u32 %s1016_s6, 4  ;;  %s934_s7 = int_to_ptr.vmem [resolvable:$false] %s933_s7 }
  0x33   : > { %270 = vadd.xlane.f32.xlu1 %v244_v10  ;;  %794 = vmatpush3.msra.mxu0 %v290_v18  ;;  %v313_v34 = vsub.s32 %v310_v27, %v300_v23  ;;  %s935_s15 = scalar_lea.vmem %s934_s7, 32  ;;  %p936_p1 = scmp.lt.s32.totalorder %s679_s23, %s934_s7 }
  0x34   : > { %266 = vadd.xlane.f32.xlu0 %v242_v11  ;;  %805 = vmatpush3.msra.mxu1 %v290_v18  ;;  %p931_p12 = pnand %p930_p8, %p1088_p9  ;;  %p937_p3 = scmp.lt.s32.totalorder %s935_s15, %s929_s5 }
  0x35   : > { %795 = vmatprep.subr.mxu0 %v1014_v16  ;;  %806 = vmatprep.subr.mxu1 %v1014_v16 }
  0x36   : > { %796 = vmatpush3.msra.mxu0 %v289_v19  ;;  %807 = vmatpush3.msra.mxu1 %v289_v19  ;;  %p932_p0 = pneg %p931_p12  ;;  %p938_p5 = por %p937_p3, %p936_p1 }
  0x37   : > { %282 = vmax.xlane.f32.xlu1 %v246_v12  ;;  %797 = vmatprep.subr.mxu0 %v1014_v16 }
  0x38   : > { %280 = vmax.xlane.f32.xlu0 %v245_v13  ;;  %808 = vmatprep.subr.mxu1 %v1014_v16  ;;  %p939_p6 = pnand %p938_p5, %p932_p0 }
  0x39   : > { %798 = vmatpush3.msra.mxu0 %v288_v20  ;;  %809 = vmatpush3.msra.mxu1 %v288_v20 }
  0x3a   : > { %818 = vmatprep.subr.mxu1 %v1014_v16  ;;  %813 = vmatprep.subr.mxu0 %v1014_v16 }
  0x3b   : > { %286 = vmax.xlane.f32.xlu1 %v248_v14 }
  0x3c   : > { %284 = vmax.xlane.f32.xlu0 %v247_v15 }
  0xb8   : > { %v269_v24 = vpop.xlane.xlu1 %268 }
  0xb9   : > { %v265_v28 = vpop.xlane.xlu0 %264  ;;  %v274_v35 = vmul.f32 0.00390625, %v269_v24 }
  0xba   : > { %v272_v30 = vmul.f32 0.00390625, %v265_v28 }
  0xbb   : > { %v314_v43 = vrot.slane %v274_v35, %v313_v34 }
  0xbc   : > { %v271_v32 = vpop.xlane.xlu1 %270  ;;  %v302_v39 = vrot.slane %v272_v30, %v301_v29 }
  0xbd   : > { %v275_v36 = vmul.f32 0.00390625, %v271_v32  ;;  %v267_v37 = vpop.xlane.xlu0 %266 }
  0xbe   : > { %v273_v38 = vmul.f32 0.00390625, %v267_v37 }
  0xbf   : > { %v321_v40 = vrot.slane %v275_v36, %v320_v31 }
  0xc0   : > { %v307_v41 = vrot.slane %v273_v38, %v306_v33  ;;  %v283_v42 = vpop.xlane.xlu1 %282 }
  0xc1   : > { %v281_v44 = vpop.xlane.xlu0 %280  ;;  %v408_v46 = vrot.slane %v283_v42, %v306_v33 }
  0xc2   : > { %v309_v45 = vsel %vm308_vm1, %v307_v41, %v302_v39  ;;  %v404_v47 = vrot.slane %v281_v44, %v301_v29 }
  0xc3   : > { %v316_v48 = vsel %vm315_vm2, %v314_v43, %v309_v45 }
  0xc4   : > { %v323_v49 = vsel %vm322_vm3, %v321_v40, %v316_v48  ;;  %v287_v50 = vpop.xlane.xlu1 %286  ;;  %v409_v54 = vsel %vm308_vm1, %v408_v46, %v404_v47 }
  0xc5   : > { %800 = vmatmul.mubr.msk.f32.vlgmr.msra.gmra.mxu0 %vm324_vm4, %v323_v49  ;;  %v285_v51 = vpop.xlane.xlu0 %284  ;;  %v418_v52 = vrot.slane %v287_v50, %v320_v31 }
  0xc6   : > { %v413_v53 = vrot.slane %v285_v51, %v313_v34  ;;  %815 = vmatprep.mubr.msk.f32.mxu0 %vm1015_vm0, %v1014_v16  ;;  %814 = vmatpush3.msk.msra.mxu0 %vm510_vm5, %v292_v57 }
  0xc8   : > { %v414_v55 = vsel %vm315_vm2, %v413_v53, %v409_v54 }
  0xc9   : > { %v419_v56 = vsel %vm322_vm3, %v418_v52, %v414_v55 }
  0xca   : > { %811 = vmatmul.mubr.msk.f32.vlgmr.msra.gmra.mxu1 %vm324_vm4, %v419_v56 }
  0xcb   : > { %820 = vmatprep.mubr.msk.f32.mxu1 %vm1015_vm0, %v1014_v16  ;;  %819 = vmatpush3.msk.msra.mxu1 %vm510_vm5, %v292_v57 }
 0x185   : > { %v393_v58 = vpop.f32.mrf.mxu0 }
 0x186   : > { %v766_v59 = vmul.f32 -1.442695, %v393_v58 }
 0x187   : > { %v801_v60 = vpop.f32.mrf.mxu0 }
 0x188   : > { %889 = vpow2.f32 %v766_v59 }
 0x18a   : > { %v488_v61 = vpop.f32.mrf.mxu1 }
 0x18b   : > { %v767_v62 = vmul.f32 -1.442695, %v488_v61 }
 0x18c   : > { %v812_v63 = vpop.f32.mrf.mxu1 }
 0x18d   : > { %891 = vpow2.f32 %v767_v62 }
 0x195   : > { %v890_v0 = vpop.eup %889 }
 0x196   : > { %v495_v1 = vadd.f32 1.0, %v890_v0 }
 0x198   : > { %893 = vrcp.f32 %v495_v1 }
 0x19a   : > { %v892_v2 = vpop.eup %891 }
 0x19b   : > { %v502_v3 = vadd.f32 1.0, %v892_v2 }
 0x19d   : > { %895 = vrcp.f32 %v502_v3 }
 0x1a5   : > { %v894_v4 = vpop.eup %893 }
 0x1a6   : > { %v498_v5 = vmul.f32 %v894_v4, %v393_v58 }
 0x1a8   : > { %821 = vmatmul.mubr.msk.f32.vlgmr.msra.gmra.mxu1 %vm506_vm6, %v498_v5 }
 0x1aa   : > { %v896_v6 = vpop.eup %895 }
 0x1ab   : > { %v505_v7 = vmul.f32 %v896_v6, %v488_v61 }
 0x1ad   : > { %816 = vmatmul.mubr.msk.f32.vlgmr.msra.gmra.mxu0 %vm506_vm6, %v505_v7 }
 0x268   : > { %v653_v8 = vpop.f32.mrf.mxu1 }
 0x26a   : > { %v822_v9 = vpop.f32.mrf.mxu1 }
 0x26d   : > { %v580_v10 = vpop.f32.mrf.mxu0 }
 0x26e   : > { %v654_v11 = vadd.f32 %v653_v8, %v580_v10 }
 0x26f   : > { %v817_v12 = vpop.f32.mrf.mxu0 }
 0x270   : > { %v772_v13 = vmul.f32 -1.442695, %v654_v11 }
 0x272   : > { %897 = vpow2.f32 %v772_v13 }
 0x27f   : > { %v898_v14 = vpop.eup %897 }
 0x280   : > { %v660_v15 = vadd.f32 1.0, %v898_v14 }
 0x282   : > { %899 = vrcp.f32 %v660_v15 }
 0x28f   : > { %v900_v16 = vpop.eup %899 }
 0x290   : > { %664 = vst.msk [vmem:[%s203_s22] sm:$0x1] %vm663_vm7, %v900_v16 }
 0x291   : > { %942 = shalt.err (!%p939_p6)
}
 0x292   : > { %s943_s8 = scalar_lea.hbm %s1171_s4, 16  ;;  %s947_s10 = scalar_lea.hbm %s1216_s3, 32 }
 0x293   : > { %p944_p7 = scmp.ne.s32.totalorder %s1171_s4, %s943_s8  ;;  %p948_p13 = scmp.lt.s32.totalorder %s1171_s4, %s1216_s3 }
 0x294   : > { %p949_p2 = scmp.lt.s32.totalorder %s947_s10, %s943_s8 }
 0x295   : > { %p945_p10 = pnand %p944_p7, %p1088_p9 }
 0x296   : > { %p950_p8 = por %p949_p2, %p948_p13 }
 0x297   : > { %p946_p4 = pneg %p945_p10 }
 0x299   : > { %p951_p12 = pnand %p950_p8, %p946_p4 }
 0x29b   : > { %954 = shalt.err (!%p951_p12)
}
 0x29c   : > { %825 = dma.vmem_to_hbm [thread:$0]  (%p1088_p9), %s679_s23, 16, %s1171_s4, %s666_s24  }
 0x29d PF: > { %s690_s19 = sand.u32 1, %s989_s12   ;;  %p1222_p0 = scmp.ge.s32.totalorder %s1009_s17, 2 }
 0x29e   : > { %s691_s21 = scalar_lea.sflag [#allocation6], %s690_s19 }
 0x29f   : > { %p832_p1 = pnand %p1222_p0, %p1095_p11 }
 0x2a1   : > { %p833_p3 = pneg %p832_p1 }
 0x2a3   : > { %984 = dma.done.wait (%p833_p3), %s691_s21, 16  }
 0x2a4   : > { %986 = vsyncadd (%p833_p3), %s691_s21, 4294967280  ;;  %s19_s17 = sadd.s32 1, %s1009_s17   ;;  %s1223_s12 = smov %s993_s13 }
 0x2a5   : > { %p16_p5 = scmp.ge.s32.totalorder %s19_s17, 4   ;;  %s1224_s13 = smov %s997_s14 }
 0x2a6   : > { %s1225_s14 = smov %s1093_s26  ;;  %s1226_s15 = smov %s1005_s16 }
 0x2a7   : > { %s1227_s16 = smov %s1229_s20  ;;  %18 = sbr.rel (!%p16_p5) target bundleno = 6 (0x6), region = 85 }
 0x2ac   :  { %695 = vsyncpa [#allocation5], 1 }
 0x2ad   :  { %697 = vsyncpa [#allocation5 + $0x1], 1 }
 0x2ae   :  { %698 = vsyncpa [#allocation6], 1 }
 0x2af   :  { %700 = vsyncpa [#allocation6 + $0x1], 1 }

</bundles_post_ra>
